<compile_context>
chip_gen: v6e
topology: v6e:2x2x1
jax: 0.10.0
libtpu: 0.0.40
codegen_flags: <defaults>
</compile_context>

<pallas_src>
import functools
import numpy as np
import jax
import jax.numpy as jnp
from jax.experimental import pallas as pl
from jax.experimental.pallas import tpu as pltpu


def _round_up(x, m):
    return (x + m - 1) // m * m


# ---------------------------------------------------------------------------
# Kernel: one batch tile of the 3-layer MLP.  The parameter slab holds (rows):
#   [0, S_pad)            : W1  (padded to [S_pad, W])
#   [S_pad, S_pad+W)      : W2  (padded to [W, W])
#   [S_pad+W, S_pad+2W)   : W3  (padded to [W, W])
#   [S_pad+2W, +8)        : biases, row 0 = b1, row 1 = b2, row 2 = b3
# All offsets are multiples of 8, so the static slices are tile-aligned views.
# ---------------------------------------------------------------------------
def _make_policy_kernel(s_pad, w):
    w2_off = s_pad
    w3_off = s_pad + w
    b_off = s_pad + 2 * w

    def kernel(x_ref, p_ref, mean_ref):
        x = x_ref[...]                                        # [TB, S_pad]
        biases = p_ref[b_off:b_off + 8, :]                    # [8, W]
        h1 = jnp.tanh(
            jnp.dot(x, p_ref[0:s_pad, :],
                    preferred_element_type=jnp.float32)
            + biases[0:1, :])                                 # [TB, W]
        h2 = jnp.tanh(
            jnp.dot(h1, p_ref[w2_off:w2_off + w, :],
                    preferred_element_type=jnp.float32)
            + biases[1:2, :])                                 # [TB, W]
        # TODO(synk): torch.isnan(action_mean).any() -> print(state) debug
        # branch has no side-effect-free Pallas equivalent; omitted.
        mean_ref[...] = (
            jnp.dot(h2, p_ref[w3_off:w3_off + w, :],
                    preferred_element_type=jnp.float32)
            + biases[2:3, :])                                 # [TB, W]
    return kernel


# ---------------------------------------------------------------------------
# One-time parameter packing (outside the per-step kernel call).
# ---------------------------------------------------------------------------
def pack_policy_params(params):
    """Pack (w1,b1,w2,b2,w3,b3,logstd) into one lane-dense slab.

    Returns (slab [R, W] f32, std_row [1, A] f32, dims=(S, A, S_pad, W)).
    """
    w1, b1, w2, b2, w3, b3, logstd = params
    s_dim, hd = w1.shape
    a_dim = w3.shape[1]
    s_pad = _round_up(s_dim, 8)
    w = _round_up(max(hd, a_dim), 128)
    r = s_pad + 2 * w + 8

    slab = jnp.zeros((r, w), jnp.float32)
    slab = slab.at[:s_dim, :hd].set(w1)
    slab = slab.at[s_pad:s_pad + hd, :hd].set(w2)
    slab = slab.at[s_pad + w:s_pad + w + hd, :a_dim].set(w3)
    b_off = s_pad + 2 * w
    slab = slab.at[b_off + 0, :hd].set(b1.reshape(-1))
    slab = slab.at[b_off + 1, :hd].set(b2.reshape(-1))
    slab = slab.at[b_off + 2, :a_dim].set(b3.reshape(-1))

    std_row = jnp.exp(logstd).reshape(1, a_dim)   # state-independent
    dims = (s_dim, a_dim, s_pad, w)
    return slab, std_row, dims


# ---------------------------------------------------------------------------
# Wrapper: batch-tiled pallas_call; returns (action_mean, action_std), the
# parameters of the Normal distribution.
# ---------------------------------------------------------------------------
@functools.partial(jax.jit, static_argnames=("dims",))
def policy_forward(state, slab, std_row, dims):
    s_dim, a_dim, s_pad, w = dims
    b = state.shape[0]

    tb = min(512, _round_up(b, 8))        # batch tile (rows per grid step)
    b_pad = _round_up(b, tb)

    x = state
    if (b_pad != b) or (s_pad != s_dim):
        x = jnp.zeros((b_pad, s_pad), state.dtype).at[:b, :s_dim].set(state)

    r = slab.shape[0]
    kernel = _make_policy_kernel(s_pad, w)

    mean_pad = pl.pallas_call(
        kernel,
        out_shape=jax.ShapeDtypeStruct((b_pad, w), jnp.float32),
        grid_spec=pltpu.PrefetchScalarGridSpec(
            num_scalar_prefetch=0,
            grid=(b_pad // tb,),
            in_specs=[
                pl.BlockSpec((tb, s_pad), lambda i: (i, 0)),
                # constant index_map -> weight slab stays VMEM-resident
                pl.BlockSpec((r, w), lambda i: (0, 0)),
            ],
            out_specs=pl.BlockSpec((tb, w), lambda i: (i, 0)),
        ),
        compiler_params=pltpu.CompilerParams(
            dimension_semantics=("parallel",)),
    )(x, slab)

    mean = mean_pad[:b, :a_dim]
    std = jnp.broadcast_to(std_row, mean.shape)
    return mean, std


# ---------------------------------------------------------------------------
# Deterministic parameter init mirroring `layer_init`:
#   orthogonal_(weight, gain) ; constant_(bias, 0.0)
# PyTorch Linear weight is [out, in]; we build it that way, orthogonalize,
# scale by gain, then transpose to [in, out] for the kernel.
# ---------------------------------------------------------------------------
def _orthogonal(key, out_dim, in_dim, gain):
    rows, cols = out_dim, in_dim
    flat = jax.random.normal(key, (max(rows, cols), min(rows, cols)),
                             dtype=jnp.float32)
    q, r = jnp.linalg.qr(flat)
    q = q * jnp.sign(jnp.diagonal(r))            # make decomposition unique
    if rows < cols:
        q = q.T
    w = gain * q[:rows, :cols]                   # [out, in]
    return w.T                                   # [in, out] for x @ W


def init_policy_params(key, state_dim, action_dim, hd):
    k1, k2, k3 = jax.random.split(key, 3)
    w1 = _orthogonal(k1, hd, state_dim, np.sqrt(2))
    w2 = _orthogonal(k2, hd, hd, np.sqrt(2))
    w3 = _orthogonal(k3, action_dim, hd, 0.01)
    b1 = jnp.zeros((1, hd), jnp.float32)
    b2 = jnp.zeros((1, hd), jnp.float32)
    b3 = jnp.zeros((1, action_dim), jnp.float32)
    logstd = jnp.full((1, action_dim), np.log(0.3), jnp.float32)
    return (w1, b1, w2, b2, w3, b3, logstd)


# ---------------------------------------------------------------------------
# Reference (pure JAX) for a correctness sanity check.
# ---------------------------------------------------------------------------
def policy_forward_ref(state, params):
    w1, b1, w2, b2, w3, b3, logstd = params
    h1 = jnp.tanh(state @ w1 + b1)
    h2 = jnp.tanh(h1 @ w2 + b2)
    mean = h2 @ w3 + b3
    std = jnp.broadcast_to(jnp.exp(logstd), mean.shape)
    return mean, std


if __name__ == "__main__":
    key = jax.random.PRNGKey(0)
    k_param, k_state = jax.random.split(key)

    batch, state_dim, action_dim, hd = 4, 8, 4, 32
    params = init_policy_params(k_param, state_dim, action_dim, hd)
    state = jax.random.normal(k_state, (batch, state_dim), dtype=jnp.float32)

    slab, std_row, dims = pack_policy_params(params)

    mean, std = jax.block_until_ready(
        policy_forward(state, slab, std_row, dims))
    mean_ref, std_ref = policy_forward_ref(state, params)

    np.testing.assert_allclose(np.asarray(mean), np.asarray(mean_ref),
                               rtol=1e-5, atol=1e-5)
    np.testing.assert_allclose(np.asarray(std), np.asarray(std_ref),
                               rtol=1e-6, atol=1e-6)
    print("KERNEL_OK")
</pallas_src>

<mosaic_0001>
module attributes {stable_mosaic.version = 11 : i64} {
  func.func @kernel(%arg0: i32, %arg1: memref<8x8xf32, #tpu.memory_space<vmem>>, %arg2: memref<272x128xf32, #tpu.memory_space<vmem>>, %arg3: memref<8x128xf32, #tpu.memory_space<vmem>>) attributes {dimension_semantics = [#tpu.dimension_semantics<parallel>], iteration_bounds = array<i64: 1>, scalar_prefetch = 0 : i64, scratch_operands = 0 : i64, tpu.core_type = #tpu.core_type<tc>, window_params = [{transform_indices = @transform_0, window_bounds = array<i64: 8, 8>}, {pipeline_mode = #tpu.pipeline_mode<synchronous>, transform_indices = @transform_1, window_bounds = array<i64: 272, 128>}, {transform_indices = @transform_2, window_bounds = array<i64: 8, 128>}]} {
    %c0 = arith.constant 0 : index
    %c0_0 = arith.constant 0 : index
    %0 = vector.load %arg1[%c0, %c0_0] : memref<8x8xf32, #tpu.memory_space<vmem>>, vector<8x8xf32>
    %c264 = arith.constant 264 : index
    %c0_1 = arith.constant 0 : index
    %1 = vector.load %arg2[%c264, %c0_1] : memref<272x128xf32, #tpu.memory_space<vmem>>, vector<8x128xf32>
    %c0_2 = arith.constant 0 : index
    %c0_3 = arith.constant 0 : index
    %2 = vector.load %arg2[%c0_2, %c0_3] : memref<272x128xf32, #tpu.memory_space<vmem>>, vector<8x128xf32>
    %cst = arith.constant dense<0.000000e+00> : vector<8x128xf32>
    %3 = tpu.matmul %0, %2, %cst {dimension_numbers = #tpu.dot_dimension_numbers<[1], [0], [0], [1], [0, 0, 1, 1], [], []>} : vector<8x8xf32>, vector<8x128xf32>, vector<8x128xf32> -> vector<8x128xf32>
    %4 = vector.extract_strided_slice %1 {offsets = [0, 0], sizes = [1, 128], strides = [1, 1]} : vector<8x128xf32> to vector<1x128xf32>
    %5 = vector.broadcast %4 : vector<1x128xf32> to vector<8x128xf32>
    %6 = arith.addf %3, %5 : vector<8x128xf32>
    %7 = math.tanh %6 : vector<8x128xf32>
    %c8 = arith.constant 8 : index
    %c0_4 = arith.constant 0 : index
    %8 = vector.load %arg2[%c8, %c0_4] : memref<272x128xf32, #tpu.memory_space<vmem>>, vector<128x128xf32>
    %cst_5 = arith.constant dense<0.000000e+00> : vector<8x128xf32>
    %9 = tpu.matmul %7, %8, %cst_5 {dimension_numbers = #tpu.dot_dimension_numbers<[1], [0], [0], [1], [0, 0, 1, 1], [], []>} : vector<8x128xf32>, vector<128x128xf32>, vector<8x128xf32> -> vector<8x128xf32>
    %10 = vector.extract_strided_slice %1 {offsets = [1, 0], sizes = [1, 128], strides = [1, 1]} : vector<8x128xf32> to vector<1x128xf32>
    %11 = vector.broadcast %10 : vector<1x128xf32> to vector<8x128xf32>
    %12 = arith.addf %9, %11 : vector<8x128xf32>
    %13 = math.tanh %12 : vector<8x128xf32>
    %c136 = arith.constant 136 : index
    %c0_6 = arith.constant 0 : index
    %14 = vector.load %arg2[%c136, %c0_6] : memref<272x128xf32, #tpu.memory_space<vmem>>, vector<128x128xf32>
    %cst_7 = arith.constant dense<0.000000e+00> : vector<8x128xf32>
    %15 = tpu.matmul %13, %14, %cst_7 {dimension_numbers = #tpu.dot_dimension_numbers<[1], [0], [0], [1], [0, 0, 1, 1], [], []>} : vector<8x128xf32>, vector<128x128xf32>, vector<8x128xf32> -> vector<8x128xf32>
    %16 = vector.extract_strided_slice %1 {offsets = [2, 0], sizes = [1, 128], strides = [1, 1]} : vector<8x128xf32> to vector<1x128xf32>
    %17 = vector.broadcast %16 : vector<1x128xf32> to vector<8x128xf32>
    %18 = arith.addf %15, %17 : vector<8x128xf32>
    %c0_8 = arith.constant 0 : index
    %c0_9 = arith.constant 0 : index
    %19 = vector.load %arg3[%c0_8, %c0_9] : memref<8x128xf32, #tpu.memory_space<vmem>>, vector<8x128xf32>
    tpu.vector_store %arg3[%c0_8, %c0_9], %18 {strides = array<i32>} : memref<8x128xf32, #tpu.memory_space<vmem>>, vector<8x128xf32>,
    return
  }
  func.func @transform_0(%arg0: i32) -> (i32, i32) {
    %c0_i32 = arith.constant 0 : i32
    %c0_i32_0 = arith.constant 0 : i32
    return %arg0, %c0_i32 : i32, i32
  }
  func.func @transform_1(%arg0: i32) -> (i32, i32) {
    %c0_i32 = arith.constant 0 : i32
    %c0_i32_0 = arith.constant 0 : i32
    %c0_i32_1 = arith.constant 0 : i32
    return %c0_i32, %c0_i32_0 : i32, i32
  }
  func.func @transform_2(%arg0: i32) -> (i32, i32) {
    %c0_i32 = arith.constant 0 : i32
    %c0_i32_0 = arith.constant 0 : i32
    return %arg0, %c0_i32 : i32, i32
  }
}

</mosaic_0001>

<bundles_post_ra>
// kernel: policy_forward.1
= control target key start
LH: loop header
LB: loop body
LE: loop exit
PB: predicated region body
PF: predicated region fallthrough
CT: control target
= control target key end

     0   :  { %7 = vsyncpa [#allocation3], 0  ;;  %s437_s9 = smov [#allocation2]   ;;  %s505_s0 = inlined_call_operand.vmem [shape: f32[8,8], index: 0, kind: input, shape index: {}]   ;;  %s506_s1 = inlined_call_operand.hbm [shape: f32[272,128], index: 1, kind: input, shape index: {}]   ;;  %s507_s2 = inlined_call_operand.vmem [shape: f32[8,128], index: 2, kind: output, shape index: {}]  }
   0x1   :  { %s15_s10 = sshll.u32 %s437_s9, 4  ;;  %s16_s10 = int_to_ptr.vmem [resolvable:$true] %s15_s10 }
   0x2   :  { %s423_s11 = scalar_lea.vmem %s16_s10, 4352  ;;  %p428_p1 = scmp.lt.s32.totalorder %s16_s10, %s16_s10 }
   0x3   :  { %p424_p0 = scmp.ne.s32.totalorder %s16_s10, %s423_s11  ;;  %p429_p2 = scmp.lt.s32.totalorder %s423_s11, %s423_s11 }
   0x5   :  { %p430_p3 = por %p429_p2, %p428_p1 }
   0x7   :  { %p431_p4 = pnand %p430_p3, %p424_p0 }
   0x9   :  { %434 = shalt.err (!%p431_p4)
}
   0xa   :  { %s438_s12 = smov 128   ;;  %s439_s13 = smov 8  }
   0xb   :  { %21 = dma.hbm_to_vmem [thread:$0]  %s506_s1, 4352, %s16_s10, [#allocation3], %s438_s12, %s438_s12, %s439_s13  }
   0xc   :  { %435 = dma.done.wait [#allocation3], 4352  }
   0xd   :  { %436 = vsyncadd [#allocation3], 4294962944  ;;  %v440_v0 = vmov 0.0   ;;  %vm441_vm0 = vmmov 0   ;;  %vm32_vm1 = vcmask 64512   ;;  %v27_v1 = vld [vmem:[#allocation2] sm:$0xff]  ;;  %v28_v26 = vlaneseq }
   0xe   :  { %331 = vmatprep.subr.mxu0 %v440_v0  ;;  %333 = vmatprep.mubr.msk.f32.mxu0 %vm441_vm0, %v440_v0  ;;  %v25_v2 = vld [vmem:[%s505_s0] sm:$0xff]  ;;  %v121_v4 = vld [vmem:[#allocation2 + $0x78] sm:$0xff]  ;;  %v120_v5 = vld [vmem:[#allocation2 + $0x70] sm:$0xff] }
   0xf   :  { %336 = vmatprep.subr.mxu1 %v440_v0  ;;  %368 = vmatprep.mubr.msk.f32.mxu1 %vm441_vm0, %v440_v0  ;;  %v122_v3 = vld [vmem:[#allocation2 + $0x80] sm:$0xff]  ;;  %v119_v6 = vld [vmem:[#allocation2 + $0x68] sm:$0xff]  ;;  %v117_v8 = vld [vmem:[#allocation2 + $0x58] sm:$0xff]  ;;  %v29_v27 = vshrl.u32 %v28_v26, 7 }
  0x10   :  { %332 = vmatpush3.msra.mxu0 %v27_v1  ;;  %337 = vmatpush3.msra.mxu1 %v122_v3  ;;  %v118_v7 = vld [vmem:[#allocation2 + $0x60] sm:$0xff]  ;;  %v116_v9 = vld [vmem:[#allocation2 + $0x50] sm:$0xff]  ;;  %v115_v10 = vld [vmem:[#allocation2 + $0x48] sm:$0xff] }
  0x11   :  { %334 = vmatmul.mubr.msk.f32.vlgmr.msra.gmra.mxu0 %vm32_vm1, %v25_v2  ;;  %338 = vmatprep.subr.mxu1 %v440_v0  ;;  %v114_v11 = vld [vmem:[#allocation2 + $0x40] sm:$0xff]  ;;  %v113_v12 = vld [vmem:[#allocation2 + $0x38] sm:$0xff]  ;;  %v112_v13 = vld [vmem:[#allocation2 + $0x30] sm:$0xff]  ;;  %v30_v28 = vsub.s32 0, %v29_v27  ;;  %v125_v44 = vsub.s32 1, %v29_v27  ;;  %v216_v50 = vsub.s32 2, %v29_v27 }
  0x12   :  { %339 = vmatpush3.msra.mxu1 %v121_v4  ;;  %371 = vmatprep.subr.mxu0 %v440_v0  ;;  %v111_v14 = vld [vmem:[#allocation2 + $0x28] sm:$0xff]  ;;  %v110_v15 = vld [vmem:[#allocation2 + $0x20] sm:$0xff]  ;;  %v109_v16 = vld [vmem:[#allocation2 + $0x18] sm:$0xff] }
  0x13   :  { %340 = vmatprep.subr.mxu1 %v440_v0  ;;  %403 = vmatprep.mubr.msk.f32.mxu0 %vm441_vm0, %v440_v0  ;;  %v108_v17 = vld [vmem:[#allocation2 + $0x10] sm:$0xff]  ;;  %v107_v18 = vld [vmem:[#allocation2 + $0x8] sm:$0xff]  ;;  %v213_v19 = vld [vmem:[#allocation2 + $0x100] sm:$0xff] }
  0x14   :  { %341 = vmatpush3.msra.mxu1 %v120_v5  ;;  %v212_v20 = vld [vmem:[#allocation2 + $0xf8] sm:$0xff]  ;;  %372 = vmatpush3.msra.mxu0 %v213_v19  ;;  %v211_v21 = vld [vmem:[#allocation2 + $0xf0] sm:$0xff]  ;;  %v210_v22 = vld [vmem:[#allocation2 + $0xe8] sm:$0xff] }
  0x15   :  { %342 = vmatprep.subr.mxu1 %v440_v0  ;;  %373 = vmatprep.subr.mxu0 %v440_v0  ;;  %v209_v23 = vld [vmem:[#allocation2 + $0xe0] sm:$0xff]  ;;  %v208_v24 = vld [vmem:[#allocation2 + $0xd8] sm:$0xff]  ;;  %v207_v25 = vld [vmem:[#allocation2 + $0xd0] sm:$0xff] }
  0x16   :  { %343 = vmatpush3.msra.mxu1 %v119_v6  ;;  %374 = vmatpush3.msra.mxu0 %v212_v20  ;;  %v26_v29 = vld [vmem:[#allocation2 + $0x108] sm:$0xff]  ;;  %v205_v36 = vld [vmem:[#allocation2 + $0xc0] sm:$0xff]  ;;  %v204_v37 = vld [vmem:[#allocation2 + $0xb8] sm:$0xff] }
  0x17   :  { %344 = vmatprep.subr.mxu1 %v440_v0  ;;  %375 = vmatprep.subr.mxu0 %v440_v0  ;;  %v31_v30 = vrot.slane %v26_v29, %v30_v28  ;;  %v206_v35 = vld [vmem:[#allocation2 + $0xc8] sm:$0xff]  ;;  %v203_v38 = vld [vmem:[#allocation2 + $0xb0] sm:$0xff]  ;;  %v201_v40 = vld [vmem:[#allocation2 + $0xa0] sm:$0xff]  ;;  %v126_v45 = vrot.slane %v26_v29, %v125_v44  ;;  %v217_v51 = vrot.slane %v26_v29, %v216_v50 }
  0x18   :  { %345 = vmatpush3.msra.mxu1 %v118_v7  ;;  %376 = vmatpush3.msra.mxu0 %v211_v21  ;;  %v202_v39 = vld [vmem:[#allocation2 + $0xa8] sm:$0xff]  ;;  %v200_v41 = vld [vmem:[#allocation2 + $0x98] sm:$0xff]  ;;  %v199_v42 = vld [vmem:[#allocation2 + $0x90] sm:$0xff] }
  0x19   :  { %346 = vmatprep.subr.mxu1 %v440_v0  ;;  %377 = vmatprep.subr.mxu0 %v440_v0  ;;  %v198_v43 = vld [vmem:[#allocation2 + $0x88] sm:$0xff] }
  0x1a   :  { %347 = vmatpush3.msra.mxu1 %v117_v8  ;;  %378 = vmatpush3.msra.mxu0 %v210_v22 }
  0x1b   :  { %348 = vmatprep.subr.mxu1 %v440_v0  ;;  %379 = vmatprep.subr.mxu0 %v440_v0 }
  0x1c   :  { %349 = vmatpush3.msra.mxu1 %v116_v9  ;;  %380 = vmatpush3.msra.mxu0 %v209_v23 }
  0x1d   :  { %350 = vmatprep.subr.mxu1 %v440_v0  ;;  %381 = vmatprep.subr.mxu0 %v440_v0 }
  0x1e   :  { %351 = vmatpush3.msra.mxu1 %v115_v10  ;;  %382 = vmatpush3.msra.mxu0 %v208_v24 }
  0x1f   :  { %352 = vmatprep.subr.mxu1 %v440_v0  ;;  %383 = vmatprep.subr.mxu0 %v440_v0 }
  0x20   :  { %353 = vmatpush3.msra.mxu1 %v114_v11  ;;  %384 = vmatpush3.msra.mxu0 %v207_v25 }
  0x21   :  { %354 = vmatprep.subr.mxu1 %v440_v0  ;;  %385 = vmatprep.subr.mxu0 %v440_v0 }
  0x22   :  { %355 = vmatpush3.msra.mxu1 %v113_v12  ;;  %386 = vmatpush3.msra.mxu0 %v206_v35 }
  0x23   :  { %356 = vmatprep.subr.mxu1 %v440_v0  ;;  %387 = vmatprep.subr.mxu0 %v440_v0 }
  0x24   :  { %357 = vmatpush3.msra.mxu1 %v112_v13  ;;  %388 = vmatpush3.msra.mxu0 %v205_v36 }
  0x25   :  { %358 = vmatprep.subr.mxu1 %v440_v0  ;;  %389 = vmatprep.subr.mxu0 %v440_v0 }
  0x26   :  { %359 = vmatpush3.msra.mxu1 %v111_v14  ;;  %390 = vmatpush3.msra.mxu0 %v204_v37 }
  0x27   :  { %360 = vmatprep.subr.mxu1 %v440_v0  ;;  %391 = vmatprep.subr.mxu0 %v440_v0 }
  0x28   :  { %361 = vmatpush3.msra.mxu1 %v110_v15  ;;  %392 = vmatpush3.msra.mxu0 %v203_v38 }
  0x29   :  { %362 = vmatprep.subr.mxu1 %v440_v0  ;;  %393 = vmatprep.subr.mxu0 %v440_v0 }
  0x2a   :  { %363 = vmatpush3.msra.mxu1 %v109_v16  ;;  %394 = vmatpush3.msra.mxu0 %v202_v39 }
  0x2b   :  { %364 = vmatprep.subr.mxu1 %v440_v0  ;;  %395 = vmatprep.subr.mxu0 %v440_v0 }
  0x2c   :  { %365 = vmatpush3.msra.mxu1 %v108_v17  ;;  %396 = vmatpush3.msra.mxu0 %v201_v40 }
  0x2d   :  { %366 = vmatprep.subr.mxu1 %v440_v0  ;;  %397 = vmatprep.subr.mxu0 %v440_v0 }
  0x2e   :  { %367 = vmatpush3.msra.mxu1 %v107_v18  ;;  %398 = vmatpush3.msra.mxu0 %v200_v41 }
  0x2f   :  { %399 = vmatprep.subr.mxu0 %v440_v0 }
  0x30   :  { %400 = vmatpush3.msra.mxu0 %v199_v42 }
  0x31   :  { %401 = vmatprep.subr.mxu0 %v440_v0 }
  0x32   :  { %402 = vmatpush3.msra.mxu0 %v198_v43 }
  0xd1   :  { %v102_v31 = vpop.f32.mrf.mxu0 }
  0xd2   :  { %v103_v32 = vadd.f32 %v102_v31, %v31_v30 }
  0xd3   :  { %v335_v33 = vpop.f32.mrf.mxu0 }
  0xd4   :  { %411 = vtanh.f32 %v103_v32 }
  0xe1   :  { %v412_v34 = vpop.eup %411 }
  0xe2   :  { %369 = vmatmul.mubr.f32.vlgmr.msra.gmra.mxu1 %v412_v34 }
 0x1a2   :  { %v193_v46 = vpop.f32.mrf.mxu1 }
 0x1a3   :  { %v194_v47 = vadd.f32 %v193_v46, %v126_v45 }
 0x1a4   :  { %v370_v48 = vpop.f32.mrf.mxu1 }
 0x1a5   :  { %413 = vtanh.f32 %v194_v47 }
 0x1b2   :  { %v414_v49 = vpop.eup %413 }
 0x1b3   :  { %404 = vmatmul.mubr.f32.vlgmr.msra.gmra.mxu0 %v414_v49 }
 0x273   :  { %v284_v52 = vpop.f32.mrf.mxu0 }
 0x274   :  { %v285_v53 = vadd.f32 %v284_v52, %v217_v51 }
 0x275   :  { %v405_v54 = vpop.f32.mrf.mxu0 }
 0x276   :  { %288 = vst [vmem:[%s507_s2] sm:$0xff] %v285_v53 }
 0x277   :  { %293 = vsyncpa [#allocation3], 1 }

</bundles_post_ra>
